<compile_context>
chip_gen: v7x
topology: tpu7x:2x2x1
jax: 0.10.0
libtpu: 0.0.40
codegen_flags: <defaults>
</compile_context>

<pallas_src>
import functools
import math

import jax
import jax.numpy as jnp
from jax.experimental import pallas as pl
from jax.experimental.pallas import tpu as pltpu


# ----------------------------------------------------------------------------
# Kernel body
# ----------------------------------------------------------------------------
def _ffn_kernel(x_ref, w1_ref, b1_ref, w2_ref, b2_ref, o_ref, acc_ref, *,
                th, resident):
    # Streamed path shapes:
    #   x_ref (tm, E) input dtype | w1_ref (E, th) | b1_ref (1, th) f32
    #   w2_ref (th, E)            | b2_ref (1, E)  f32
    # Resident path: w1_ref (E, H), b1_ref (1, H), w2_ref (H, E) — full arrays
    #   with constant index_map (fetched from HBM once), sliced here by pl.ds.
    # o_ref (tm, E) out dtype | acc_ref (tm, E) f32 scratch accumulator.
    j = pl.program_id(1)

    @pl.when(j == 0)
    def _init():
        acc_ref[...] = jnp.zeros_like(acc_ref)

    # In-kernel cast of the activation tile to the MXU dtype (rides the VPU
    # under MXU slack; avoids a separate full-activation HBM pass upstream).
    x = x_ref[...].astype(w1_ref.dtype)

    if resident:
        off = pl.multiple_of(j * th, th)
        w1 = w1_ref[:, pl.ds(off, th)]
        b1 = b1_ref[:, pl.ds(off, th)]
        w2 = w2_ref[pl.ds(off, th), :]
    else:
        w1 = w1_ref[...]
        b1 = b1_ref[...]
        w2 = w2_ref[...]

    # First matmul slice on the MXU: (tm, E) @ (E, th) -> f32 (tm, th).
    h = jnp.dot(x, w1, preferred_element_type=jnp.float32)
    h = jnp.maximum(h + b1.astype(jnp.float32), 0.0)   # bias + ReLU on the VPU

    # Second matmul slice, accumulated over the hidden tiles in f32.
    acc_ref[...] += jnp.dot(h.astype(w2.dtype), w2,
                            preferred_element_type=jnp.float32)

    @pl.when(j == pl.num_programs(1) - 1)
    def _finalize():
        # TODO(synk): Dropout(p=0.2) is eval-mode identity; training mode would
        # draw a keep-mask via pltpu.prng_seed / pltpu.prng_random_bits here.
        o_ref[...] = (acc_ref[...] + b2_ref[...].astype(jnp.float32)
                      ).astype(o_ref.dtype)


# ----------------------------------------------------------------------------
# Tiling / VMEM planning
# ----------------------------------------------------------------------------
_TM_CANDIDATES = (1024, 768, 512, 256, 128, 64, 32, 16, 8)
_TH_CANDIDATES = (512, 256, 128)


def _vmem_limit_bytes():
    """Per-generation VMEM budget: ~3/4 of physical, capped at 96 MiB.
    -> ~96 MiB on v5e/v6e (128 MiB physical), ~48 MiB on v7x (64 MiB)."""
    cap = 128 * 1024 * 1024
    try:
        cap = int(getattr(pltpu.get_tpu_info(), "vmem_capacity_bytes", cap))
    except Exception:  # non-TPU / interpret fallback
        pass
    return int(min((cap * 3) // 4, 96 * 1024 * 1024))


def _divisor_candidates(total, candidates):
    out = [c for c in candidates if c <= total and total % c == 0]
    return out if out else [total]


def _footprint_bytes(tm, th, E, H, x_isz, w_isz, o_isz, resident):
    """Rough VMEM footprint: double-buffered operand tiles + f32 scratch."""
    b = 2 * tm * E * x_isz           # x tile (double buffered)
    b += 2 * tm * E * o_isz          # out tile
    b += tm * E * 4                  # f32 accumulator scratch
    b += tm * th * 4                 # live f32 hidden intermediate
    if resident:
        b += 2 * 2 * E * H * w_isz   # full W1 + W2 (conservative 2x buffering)
        b += 2 * (H + E) * 4         # b1, b2
    else:
        b += 2 * 2 * E * th * w_isz  # W1 + W2 hidden slices, double-buffered
        b += 2 * (th + E) * 4
    return b


def _plan_tiles(M, E, H, x_isz, w_isz, o_isz, vmem_limit):
    """Pick (tm, th, weights_resident).

    Shrink th before tm (weight-traffic intensity per step is ~tm flops/byte);
    keep >= 2 row tiles when possible so the 'parallel' axis can shard across
    v7x's two TensorCores.
    """
    tm_opts = _divisor_candidates(M, _TM_CANDIDATES)
    th_opts = _divisor_candidates(H, _TH_CANDIDATES)
    if M >= 16:
        multi = [t for t in tm_opts if M // t >= 2]
        if multi:
            tm_opts = multi
    budget = int(vmem_limit * 0.7)   # headroom for compiler-internal scratch
    for tm in tm_opts:               # descending: biggest row tile first
        for th in th_opts:           # descending: shrink th before tm
            if _footprint_bytes(tm, th, E, H, x_isz, w_isz, o_isz, True) <= budget:
                return tm, th, True
            if _footprint_bytes(tm, th, E, H, x_isz, w_isz, o_isz, False) <= budget:
                return tm, th, False
    tm, th = tm_opts[-1], th_opts[-1]
    if _footprint_bytes(tm, th, E, H, x_isz, w_isz, o_isz, False) > vmem_limit:
        raise ValueError(
            f"FeedForward tiles (tm={tm}, th={th}) exceed the VMEM budget "
            f"({vmem_limit} bytes); pad M=B*T or H=4*n_embed to a tileable size.")
    return tm, th, False


# ----------------------------------------------------------------------------
# Wrapper
# ----------------------------------------------------------------------------
def feed_forward(x, w1, b1, w2, b2, *, tm=None, th=None):
    """x: (B, T, n_embed) -> (B, T, n_embed) = relu(x @ W1 + b1) @ W2 + b2.

    Weights are stored as (in_features, out_features) — transposed from
    PyTorch's (out, in) — and are used in their STORED dtype (no per-call
    casts; cast once with prepare_params for bf16 MXU matmuls with f32
    accumulation).  Dropout(0.2) is applied in eval mode (identity).
    """
    B, T, E = x.shape
    Ein, H = w1.shape
    assert Ein == E and w2.shape == (H, E) and b1.size == H and b2.size == E

    M = B * T
    out_dtype = x.dtype
    x2d = x.reshape(M, E)            # NO dtype cast here (done in-kernel)
    b1_2d = b1.reshape(1, H)
    b2_2d = b2.reshape(1, E)

    x_isz = jnp.dtype(x.dtype).itemsize
    w_isz = jnp.dtype(w1.dtype).itemsize
    o_isz = jnp.dtype(out_dtype).itemsize

    vmem_limit = _vmem_limit_bytes()
    auto_tm, auto_th, resident = _plan_tiles(M, E, H, x_isz, w_isz, o_isz,
                                             vmem_limit)
    tm = auto_tm if tm is None else tm
    th = auto_th if th is None else th
    if (tm, th) != (auto_tm, auto_th):
        resident = _footprint_bytes(tm, th, E, H, x_isz, w_isz, o_isz,
                                    True) <= int(vmem_limit * 0.7)
    assert M % tm == 0 and H % th == 0, (
        "B*T and 4*n_embed must be divisible by the chosen tile sizes")

    grid = (M // tm, H // th)

    if resident:
        # Full-array weight blocks with a constant index_map: fetched from HBM
        # once per kernel call instead of once per row tile.
        w1_spec = pl.BlockSpec((E, H), lambda i, j: (0, 0))
        b1_spec = pl.BlockSpec((1, H), lambda i, j: (0, 0))
        w2_spec = pl.BlockSpec((H, E), lambda i, j: (0, 0))
    else:
        # Streamed hidden slices (double-buffered by the BlockSpec pipeline).
        # v5e note: add pipeline_mode=pl.Buffered(3) here if profiling shows
        # exposed DMA at hidden-tile boundaries (skip on VMEM-tight v7x).
        w1_spec = pl.BlockSpec((E, th), lambda i, j: (0, j))
        b1_spec = pl.BlockSpec((1, th), lambda i, j: (0, j))
        w2_spec = pl.BlockSpec((th, E), lambda i, j: (j, 0))

    weight_bytes = 2 * E * H * w_isz * (1 if resident else (M // tm))
    cost = pl.CostEstimate(
        flops=4 * M * E * H,                      # two matmuls, 2 flops/MAC
        transcendentals=0,
        bytes_accessed=(M * E * x_isz + weight_bytes + (H + E) * 4
                        + M * E * o_isz),
    )

    out2d = pl.pallas_call(
        functools.partial(_ffn_kernel, th=th, resident=resident),
        out_shape=jax.ShapeDtypeStruct((M, E), out_dtype),
        grid_spec=pltpu.PrefetchScalarGridSpec(
            num_scalar_prefetch=0,
            grid=grid,
            in_specs=[
                pl.BlockSpec((tm, E), lambda i, j: (i, 0)),   # x row tile
                w1_spec, b1_spec, w2_spec,
                pl.BlockSpec((1, E), lambda i, j: (0, 0)),    # b2 (tiny, resident)
            ],
            out_specs=pl.BlockSpec((tm, E), lambda i, j: (i, 0)),
            scratch_shapes=[pltpu.VMEM((tm, E), jnp.float32)],
        ),
        compiler_params=pltpu.CompilerParams(
            dimension_semantics=("parallel", "arbitrary"),
            vmem_limit_bytes=vmem_limit,
        ),
        cost_estimate=cost,
    )(x2d, w1, b1_2d, w2, b2_2d)

    return out2d.reshape(B, T, E)


# ----------------------------------------------------------------------------
# Params
# ----------------------------------------------------------------------------
def init_params(key, n_embed):
    """nn.Linear-style init (uniform +/- 1/sqrt(fan_in)); weights are stored as
    (in_features, out_features), i.e. transposed vs PyTorch's (out, in)."""
    hidden = 4 * n_embed
    k1, k2, k3, k4 = jax.random.split(key, 4)
    bound1 = 1.0 / math.sqrt(n_embed)
    bound2 = 1.0 / math.sqrt(hidden)
    w1 = jax.random.uniform(k1, (n_embed, hidden), jnp.float32, -bound1, bound1)
    b1 = jax.random.uniform(k2, (hidden,), jnp.float32, -bound1, bound1)
    w2 = jax.random.uniform(k3, (hidden, n_embed), jnp.float32, -bound2, bound2)
    b2 = jax.random.uniform(k4, (n_embed,), jnp.float32, -bound2, bound2)
    return w1, b1, w2, b2


def prepare_params(w1, b1, w2, b2, *, weight_dtype=jnp.bfloat16):
    """ONE-TIME cast to the persistent storage dtypes: weights -> bf16 (native
    MXU dtype), biases -> f32.  Done at init so feed_forward never re-casts
    per call (no per-call HBM passes over the weights)."""
    return (w1.astype(weight_dtype), b1.astype(jnp.float32),
            w2.astype(weight_dtype), b2.astype(jnp.float32))


if __name__ == "__main__":
    B, T, n_embed = 2, 8, 32    # demo: batch=2, seq=8, n_embed=32, hidden=128
    key = jax.random.PRNGKey(0)
    kx, kp = jax.random.split(key)
    x = jax.random.normal(kx, (B, T, n_embed), jnp.float32)
    w1f, b1f, w2f, b2f = init_params(kp, n_embed)
    w1, b1, w2, b2 = prepare_params(w1f, b1f, w2f, b2f)   # one-time bf16 cast

    out = jax.block_until_ready(feed_forward(x, w1, b1, w2, b2))
    assert out.shape == (B, T, n_embed)

    # Reference with matched mixed precision (bf16 matmul inputs, f32 accum).
    xb = x.reshape(-1, n_embed).astype(jnp.bfloat16)
    h_ref = jnp.maximum(
        jnp.dot(xb, w1, preferred_element_type=jnp.float32) + b1, 0.0)
    ref = (jnp.dot(h_ref.astype(jnp.bfloat16), w2,
                   preferred_element_type=jnp.float32) + b2)
    ref = ref.reshape(B, T, n_embed).astype(x.dtype)
    assert jnp.allclose(out, ref, atol=1e-3, rtol=1e-3), \
        float(jnp.max(jnp.abs(out - ref)))

    # Loose sanity check against the pure-f32 module semantics (eval dropout).
    ref32 = (jnp.maximum(x.reshape(-1, n_embed) @ w1f + b1f, 0.0) @ w2f + b2f
             ).reshape(B, T, n_embed)
    assert jnp.allclose(out, ref32, atol=5e-2, rtol=5e-2)

    print("KERNEL_OK")
</pallas_src>

<mosaic_0001>
module attributes {stable_mosaic.version = 11 : i64} {
  func.func @_ffn_kernel(%arg0: i32, %arg1: i32, %arg2: memref<8x32xf32, #tpu.memory_space<vmem>>, %arg3: memref<32x128xbf16, #tpu.memory_space<vmem>>, %arg4: memref<1x128xf32, #tpu.memory_space<vmem>>, %arg5: memref<128x32xbf16, #tpu.memory_space<vmem>>, %arg6: memref<1x32xf32, #tpu.memory_space<vmem>>, %arg7: memref<8x32xf32, #tpu.memory_space<vmem>>, %arg8: memref<8x32xf32, #tpu.memory_space<vmem>>) attributes {dimension_semantics = [#tpu.dimension_semantics<parallel>, #tpu.dimension_semantics<arbitrary>], iteration_bounds = array<i64: 2, 1>, scalar_prefetch = 0 : i64, scratch_operands = 1 : i64, tpu.core_type = #tpu.core_type<tc>, window_params = [{transform_indices = @transform_0, window_bounds = array<i64: 8, 32>}, {pipeline_mode = #tpu.pipeline_mode<synchronous>, transform_indices = @transform_1, window_bounds = array<i64: 32, 128>}, {pipeline_mode = #tpu.pipeline_mode<synchronous>, transform_indices = @transform_2, window_bounds = array<i64: 1, 128>}, {pipeline_mode = #tpu.pipeline_mode<synchronous>, transform_indices = @transform_3, window_bounds = array<i64: 128, 32>}, {pipeline_mode = #tpu.pipeline_mode<synchronous>, transform_indices = @transform_4, window_bounds = array<i64: 1, 32>}, {transform_indices = @transform_5, window_bounds = array<i64: 8, 32>}]} {
    %c0_i32 = arith.constant 0 : i32
    %0 = arith.cmpi eq, %arg1, %c0_i32 : i32
    %1 = arith.extui %0 : i1 to i32
    %c0_i32_0 = arith.constant 0 : i32
    %2 = arith.cmpi ne, %1, %c0_i32_0 : i32
    scf.if %2 {
      %cst_13 = arith.constant 0.000000e+00 : f32
      %26 = vector.broadcast %cst_13 : f32 to vector<8x32xf32>
      %c0_14 = arith.constant 0 : index
      %c0_15 = arith.constant 0 : index
      %27 = vector.load %arg8[%c0_14, %c0_15] : memref<8x32xf32, #tpu.memory_space<vmem>>, vector<8x32xf32>
      tpu.vector_store %arg8[%c0_14, %c0_15], %26 {strides = array<i32>} : memref<8x32xf32, #tpu.memory_space<vmem>>, vector<8x32xf32>,
    } else {
    }
    %c0 = arith.constant 0 : index
    %c0_1 = arith.constant 0 : index
    %3 = vector.load %arg2[%c0, %c0_1] : memref<8x32xf32, #tpu.memory_space<vmem>>, vector<8x32xf32>
    %4 = arith.truncf %3 : vector<8x32xf32> to vector<8x32xbf16>
    %c128_i32 = arith.constant 128 : i32
    %5 = arith.muli %arg1, %c128_i32 : i32
    %6 = tpu.assume_multiple %5, 128 : i32
    %c0_2 = arith.constant 0 : index
    %7 = arith.index_cast %6 : i32 to index
    %8 = vector.load %arg3[%c0_2, %7] : memref<32x128xbf16, #tpu.memory_space<vmem>>, vector<32x128xbf16>
    %c0_3 = arith.constant 0 : index
    %9 = arith.index_cast %6 : i32 to index
    %10 = vector.load %arg4[%c0_3, %9] : memref<1x128xf32, #tpu.memory_space<vmem>>, vector<1x128xf32>
    %11 = arith.index_cast %6 : i32 to index
    %c0_4 = arith.constant 0 : index
    %12 = vector.load %arg5[%11, %c0_4] : memref<128x32xbf16, #tpu.memory_space<vmem>>, vector<128x32xbf16>
    %cst = arith.constant dense<0.000000e+00> : vector<8x128xf32>
    %13 = tpu.matmul %4, %8, %cst {dimension_numbers = #tpu.dot_dimension_numbers<[1], [0], [0], [1], [0, 0, 1, 1], [], []>} : vector<8x32xbf16>, vector<32x128xbf16>, vector<8x128xf32> -> vector<8x128xf32>
    %14 = vector.broadcast %10 : vector<1x128xf32> to vector<8x128xf32>
    %15 = arith.addf %13, %14 : vector<8x128xf32>
    %cst_5 = arith.constant 0.000000e+00 : f32
    %16 = vector.broadcast %cst_5 : f32 to vector<8x128xf32>
    %17 = arith.maximumf %15, %16 : vector<8x128xf32>
    %c0_6 = arith.constant 0 : index
    %c0_7 = arith.constant 0 : index
    %18 = vector.load %arg8[%c0_6, %c0_7] : memref<8x32xf32, #tpu.memory_space<vmem>>, vector<8x32xf32>
    %19 = arith.truncf %17 : vector<8x128xf32> to vector<8x128xbf16>
    %cst_8 = arith.constant dense<0.000000e+00> : vector<8x32xf32>
    %20 = tpu.matmul %19, %12, %cst_8 {dimension_numbers = #tpu.dot_dimension_numbers<[1], [0], [0], [1], [0, 0, 1, 1], [], []>} : vector<8x128xbf16>, vector<128x32xbf16>, vector<8x32xf32> -> vector<8x32xf32>
    %21 = arith.addf %18, %20 : vector<8x32xf32>
    %c0_9 = arith.constant 0 : index
    %c0_10 = arith.constant 0 : index
    %22 = vector.load %arg8[%c0_9, %c0_10] : memref<8x32xf32, #tpu.memory_space<vmem>>, vector<8x32xf32>
    tpu.vector_store %arg8[%c0_9, %c0_10], %21 {strides = array<i32>} : memref<8x32xf32, #tpu.memory_space<vmem>>, vector<8x32xf32>,
    %c0_i32_11 = arith.constant 0 : i32
    %23 = arith.cmpi eq, %arg1, %c0_i32_11 : i32
    %24 = arith.extui %23 : i1 to i32
    %c0_i32_12 = arith.constant 0 : i32
    %25 = arith.cmpi ne, %24, %c0_i32_12 : i32
    scf.if %25 {
      %c0_13 = arith.constant 0 : index
      %c0_14 = arith.constant 0 : index
      %26 = vector.load %arg8[%c0_13, %c0_14] : memref<8x32xf32, #tpu.memory_space<vmem>>, vector<8x32xf32>
      %c0_15 = arith.constant 0 : index
      %c0_16 = arith.constant 0 : index
      %27 = vector.load %arg6[%c0_15, %c0_16] : memref<1x32xf32, #tpu.memory_space<vmem>>, vector<1x32xf32>
      %28 = vector.broadcast %27 : vector<1x32xf32> to vector<8x32xf32>
      %29 = arith.addf %26, %28 : vector<8x32xf32>
      %c0_17 = arith.constant 0 : index
      %c0_18 = arith.constant 0 : index
      %30 = vector.load %arg7[%c0_17, %c0_18] : memref<8x32xf32, #tpu.memory_space<vmem>>, vector<8x32xf32>
      tpu.vector_store %arg7[%c0_17, %c0_18], %29 {strides = array<i32>} : memref<8x32xf32, #tpu.memory_space<vmem>>, vector<8x32xf32>,
    } else {
    }
    return
  }
  func.func @transform_0(%arg0: i32, %arg1: i32) -> (i32, i32) {
    %c0_i32 = arith.constant 0 : i32
    %c0_i32_0 = arith.constant 0 : i32
    return %arg0, %c0_i32 : i32, i32
  }
  func.func @transform_1(%arg0: i32, %arg1: i32) -> (i32, i32) {
    %c0_i32 = arith.constant 0 : i32
    %c0_i32_0 = arith.constant 0 : i32
    %c0_i32_1 = arith.constant 0 : i32
    return %c0_i32, %c0_i32_0 : i32, i32
  }
  func.func @transform_2(%arg0: i32, %arg1: i32) -> (i32, i32) {
    %c0_i32 = arith.constant 0 : i32
    %c0_i32_0 = arith.constant 0 : i32
    %c0_i32_1 = arith.constant 0 : i32
    return %c0_i32, %c0_i32_0 : i32, i32
  }
  func.func @transform_3(%arg0: i32, %arg1: i32) -> (i32, i32) {
    %c0_i32 = arith.constant 0 : i32
    %c0_i32_0 = arith.constant 0 : i32
    %c0_i32_1 = arith.constant 0 : i32
    return %c0_i32, %c0_i32_0 : i32, i32
  }
  func.func @transform_4(%arg0: i32, %arg1: i32) -> (i32, i32) {
    %c0_i32 = arith.constant 0 : i32
    %c0_i32_0 = arith.constant 0 : i32
    %c0_i32_1 = arith.constant 0 : i32
    return %c0_i32, %c0_i32_0 : i32, i32
  }
  func.func @transform_5(%arg0: i32, %arg1: i32) -> (i32, i32) {
    %c0_i32 = arith.constant 0 : i32
    %c0_i32_0 = arith.constant 0 : i32
    return %arg0, %c0_i32 : i32, i32
  }
}

</mosaic_0001>

<bundles_post_ra>
// kernel: tpu_custom_call.1
= control target key start
LH: loop header
LB: loop body
LE: loop exit
PB: predicated region body
PF: predicated region fallthrough
CT: control target
= control target key end

     0   :  { %10 = vsyncpa [#allocation4], 0  ;;  %s1417_s0 = inlined_call_operand.hbm [shape: f32[16,32], index: 0, kind: input, shape index: {}]   ;;  %s1418_s1 = inlined_call_operand.hbm [shape: bf16[32,128], index: 1, kind: input, shape index: {}]   ;;  %s1419_s2 = inlined_call_operand.hbm [shape: f32[1,128], index: 2, kind: input, shape index: {}]   ;;  %s1420_s3 = inlined_call_operand.hbm [shape: bf16[128,32], index: 3, kind: input, shape index: {}]   ;;  %s1421_s4 = inlined_call_operand.hbm [shape: f32[1,32], index: 4, kind: input, shape index: {}]   ;;  %s1422_s5 = inlined_call_operand.hbm [shape: f32[16,32], index: 5, kind: output, shape index: {}]  }
   0x1   :  { %12 = vsyncpa [#allocation4 + $0x1], 0 }
   0x2   :  { %13 = vsyncpa [#allocation7], 0 }
   0x3   :  { %14 = vsyncpa [#allocation10], 0 }
   0x4   :  { %15 = vsyncpa [#allocation5], 0 }
   0x5   :  { %17 = vsyncpa [#allocation5 + $0x1], 0  ;;  %s1114_s18 = smov 0   ;;  %s1116_s19 = smov 0  }
   0x6   :  { %s1118_s20 = smov 0   ;;  %s1120_s21 = smov 0  }
   0x7   :  { %s1122_s22 = smov 0   ;;  %s1124_s23 = smov 0  }
   0x8 LB: > { %s649_s24 = sadd.s32 4294967295, %s1072_s23   ;;  %p651_p0 = scmp.ge.s32.totalorder %s1072_s23, 1  ;;  %s1072_s23 = sphi %s1124_s23, %s23_s23   ;;  %s1068_s22 = sphi %s1122_s22, %s1446_s22   ;;  %s1064_s21 = sphi %s1120_s21, %s1445_s21   ;;  %s1060_s20 = sphi %s1118_s20, %s1444_s20   ;;  %s1056_s19 = sphi %s1116_s19, %s1443_s19   ;;  %s1052_s18 = sphi %s1114_s18, %s1442_s18  }
   0x9   : > { %p1148_p1 = scmp.eq.s32.totalorder %s649_s24, 0  ;;  %p176_p2 = scmp.lt.s32.totalorder %s1072_s23, 3 }
   0xa   : > { %s1074_s27 = smov [#allocation6]   ;;  %s1075_s30 = smov [#allocation9]  }
   0xb   : > { %s1427_s25 = scalar_select %p1148_p1, 1, 0 }
   0xc   : > { %p1153_p3 = pnand %p651_p0, %p176_p2  ;;  %s188_s28 = sshll.u32 %s1074_s27, 4  ;;  %s1157_s28 = int_to_ptr.vmem [resolvable:$true] %s188_s28 }
   0xd   : > { %s212_s6 = sshll.u32 %s1075_s30, 4  ;;  %s1076_s7 = smov [#allocation8]   ;;  %s1168_s6 = int_to_ptr.vmem [resolvable:$true] %s212_s6 }
   0xe   : > { %s1428_s26 = scalar_select %p1153_p3, 1, 0 }
   0xf   : > { %p743_p4 = pneg %p1153_p3  ;;  %s1170_s8 = sshll.u32 %s1076_s7, 4  ;;  %s203_s8 = int_to_ptr.vmem [resolvable:$true] %s1170_s8 }
  0x10   : > { %s840_s11 = scalar_lea.hbm %s1418_s1, 256 }
  0x11   : > { %p1164_p6 = pnand %p743_p4, %p1148_p1  ;;  %p841_p7 = scmp.ne.s32.totalorder %s1418_s1, %s840_s11 }
  0x12   : > { %p847_p11 = scmp.lt.u32.totalorder %s840_s11, %s1418_s1 }
  0x13   : > { %p1180_p8 = pneg %p1164_p6 }
  0x15   : > { %p843_p9 = pnand %p1180_p8, %p841_p7 }
  0x17   : > { %p844_p10 = pneg %p843_p9 }
  0x19   : > { %p849_p12 = pnand %p847_p11, %p844_p10 }
  0x1b   : > { %852 = shalt.err (!%p849_p12)
}
  0x1c   : > { %s853_s17 = scalar_lea.vmem %s1157_s28, 256  ;;  %p861_p4 = scmp.lt.s32.totalorder %s1157_s28, %s1157_s28 }
  0x1d   : > { %p854_p13 = scmp.ne.s32.totalorder %s1157_s28, %s853_s17  ;;  %p862_p5 = scmp.lt.s32.totalorder %s853_s17, %s853_s17 }
  0x1f   : > { %p856_p0 = pnand %p854_p13, %p1180_p8  ;;  %p863_p7 = por %p862_p5, %p861_p4 }
  0x21   : > { %p857_p2 = pneg %p856_p0 }
  0x23   : > { %p864_p9 = pnand %p863_p7, %p857_p2 }
  0x25   : > { %867 = shalt.err (!%p864_p9)
}
  0x26   : > { %s1077_s27 = smov 64   ;;  %s1078_s30 = smov 4  }
  0x27   : > { %746 = dma.hbm_to_vmem [thread:$0]  (!%p1164_p6), %s1418_s1, 256, %s1157_s28, [#allocation7], %s1077_s27, %s1077_s27, %s1078_s30  }
  0x28   : > { %s868_s12 = scalar_lea.hbm %s1420_s3, 1024 }
  0x29   : > { %p869_p5 = scmp.ne.s32.totalorder %s1420_s3, %s868_s12  ;;  %p875_p12 = scmp.lt.u32.totalorder %s868_s12, %s1420_s3 }
  0x2b   : > { %p871_p10 = pnand %p869_p5, %p1180_p8 }
  0x2d   : > { %p872_p11 = pneg %p871_p10 }
  0x2f   : > { %p877_p13 = pnand %p875_p12, %p872_p11 }
  0x31   : > { %880 = shalt.err (!%p877_p13)
}
  0x32   : > { %s881_s28 = scalar_lea.vmem %s1168_s6, 1024  ;;  %p889_p7 = scmp.lt.s32.totalorder %s1168_s6, %s1168_s6 }
  0x33   : > { %p882_p0 = scmp.ne.s32.totalorder %s1168_s6, %s881_s28  ;;  %p890_p9 = scmp.lt.s32.totalorder %s881_s28, %s881_s28 }
  0x35   : > { %p884_p2 = pnand %p882_p0, %p1180_p8  ;;  %p891_p5 = por %p890_p9, %p889_p7 }
  0x37   : > { %p885_p4 = pneg %p884_p2 }
  0x39   : > { %p892_p10 = pnand %p891_p5, %p885_p4 }
  0x3b   : > { %895 = shalt.err (!%p892_p10)
}
  0x3c   : > { %752 = dma.hbm_to_vmem [thread:$0]  (!%p1164_p6), %s1420_s3, 1024, %s1168_s6, [#allocation10], %s1077_s27, %s1077_s27, %s1078_s30  }
  0x3d   : > { %s896_s12 = scalar_lea.hbm %s1419_s2, 16 }
  0x3e   : > { %p897_p11 = scmp.ne.s32.totalorder %s1419_s2, %s896_s12  ;;  %p903_p0 = scmp.lt.u32.totalorder %s896_s12, %s1419_s2 }
  0x40   : > { %p899_p12 = pnand %p897_p11, %p1180_p8 }
  0x42   : > { %p900_p13 = pneg %p899_p12 }
  0x44   : > { %p905_p2 = pnand %p903_p0, %p900_p13 }
  0x46   : > { %908 = shalt.err (!%p905_p2)
}
  0x47   : > { %s909_s28 = scalar_lea.vmem %s203_s8, 16  ;;  %s916_s6 = scalar_lea.vmem %s203_s8, 32 }
  0x48   : > { %p910_p4 = scmp.ne.s32.totalorder %s203_s8, %s909_s28  ;;  %p917_p5 = scmp.lt.s32.totalorder %s203_s8, %s203_s8 }
  0x49   : > { %p918_p10 = scmp.lt.s32.totalorder %s916_s6, %s909_s28 }
  0x4a   : > { %p912_p7 = pnand %p910_p4, %p1180_p8 }
  0x4b   : > { %p919_p3 = por %p918_p10, %p917_p5 }
  0x4c   : > { %p913_p9 = pneg %p912_p7 }
  0x4e   : > { %p920_p1 = pnand %p919_p3, %p913_p9 }
  0x50   : > { %923 = shalt.err (!%p920_p1)
}
  0x51   : > { %749 = dma.hbm_to_vmem [thread:$0]  (!%p1164_p6), %s1419_s2, 16, %s203_s8, [#allocation7]  }
  0x52   : > { %s1079_s7 = smov [#allocation11]   ;;  %s924_s12 = scalar_lea.hbm %s1421_s4, 16 }
  0x53   : > { %s226_s9 = sshll.u32 %s1079_s7, 4  ;;  %p925_p11 = scmp.ne.s32.totalorder %s1421_s4, %s924_s12  ;;  %s227_s9 = int_to_ptr.vmem [resolvable:$true] %s226_s9 }
  0x54   : > { %p931_p12 = scmp.lt.u32.totalorder %s924_s12, %s1421_s4 }
  0x55   : > { %p927_p1 = pnand %p925_p11, %p1180_p8 }
  0x57   : > { %p928_p3 = pneg %p927_p1 }
  0x59   : > { %p933_p13 = pnand %p931_p12, %p928_p3 }
  0x5b   : > { %936 = shalt.err (!%p933_p13)
}
  0x5c   : > { %s937_s8 = scalar_lea.vmem %s227_s9, 16  ;;  %s944_s28 = scalar_lea.vmem %s227_s9, 32 }
  0x5d   : > { %p938_p0 = scmp.ne.s32.totalorder %s227_s9, %s937_s8  ;;  %p945_p7 = scmp.lt.s32.totalorder %s227_s9, %s227_s9 }
  0x5e   : > { %p946_p9 = scmp.lt.s32.totalorder %s944_s28, %s937_s8 }
  0x5f   : > { %p940_p2 = pnand %p938_p0, %p1180_p8 }
  0x60   : > { %p947_p5 = por %p946_p9, %p945_p7 }
  0x61   : > { %p941_p4 = pneg %p940_p2 }
  0x63   : > { %p948_p10 = pnand %p947_p5, %p941_p4 }
  0x65   : > { %951 = shalt.err (!%p948_p10)
}
  0x66   : > { %755 = dma.hbm_to_vmem [thread:$0]  (!%p1164_p6), %s1421_s4, 16, %s227_s9, [#allocation10]  }
  0x67   : > { %s650_s14 = sadd.s32 4294967294, %s1072_s23   ;;  %s35_s30 = sadd.s32 1, %s1068_s22 }
  0x68   : > { %p37_p8 = scmp.ge.s32.totalorder %s35_s30, 2  ;;  %s42_s29 = sadd.s32 1, %s1060_s20 }
  0x69   : > { %p49_p11 = scmp.ne.s32.totalorder %s1060_s20, %s1056_s19  ;;  %p50_p1 = scmp.eq.s32.totalorder %s1072_s23, 0 }
  0x6a   : > { %s1448_s30 = smov (%p37_p8, %s35_s30), 0  ;;  %p55_p12 = scmp.ne.s32.totalorder %s1056_s19, %s1052_s18 }
  0x6b   : > { %p1269_p3 = por %p50_p1, %p49_p11  ;;  %s39_s9 = ssub.s32 %s1068_s22, %s1448_s30 }
  0x6c   : > { %p163_p6 = scmp.eq.s32.totalorder %s649_s24, 1  ;;  %p40_p13 = scmp.eq.s32.totalorder %s39_s9, 0 }
  0x6d   : > { %p1432_p0 = scmp.ne.s32.totalorder %s1427_s25, 0  ;;  %p169_p7 = scmp.eq.s32.totalorder %s650_s14, 1 }
  0x6e   : > { %p1285_p4 = por %p163_p6, %p49_p11  ;;  %p768_p5 = scmp.lt.s32.totalorder %s1072_s23, 2 }
  0x6f   : > { %p1281_p2 = por %p1432_p0, %p55_p12  ;;  %p1292_p9 = por %p169_p7, %p55_p12 }
  0x70   : > { %s1434_s11 = scalar_select %p1285_p4, 1, 0 }
  0x71   : > { %s1290_s12 = scalar_select %p40_p13, %s1060_s20, %s42_s29  }
  0x72   : > { %s1435_s13 = scalar_select %p1292_p9, 1, 0 }
  0x73   : > { %s237_s15 = sand.u32 1, %s1060_s20   ;;  %s658_s24 = sshll.u32 %s1068_s22, 7 }
  0x74   : > { %s657_s16 = sshll.u32 %s237_s15, 3  ;;  %s1302_s28 = scalar_lea.hbm %s1417_s0, %s658_s24 }
  0x75   : > { %s241_s6 = scalar_lea.vmem [#allocation3], %s657_s16  ;;  %p1306_p10 = pnand %p768_p5, %p1269_p3 }
  0x76   : > { %s248_s27 = sshll.u32 %s241_s6, 4  ;;  %s238_s29 = scalar_lea.sflag [#allocation4], %s237_s15  ;;  %s1310_s27 = int_to_ptr.vmem [resolvable:$true] %s248_s27 }
  0x77   : > { %s952_s9 = scalar_lea.hbm %s1302_s28, 128  ;;  %p954_p11 = pneg %p1306_p10 }
  0x78   : > { %p953_p8 = scmp.ne.s32.totalorder %s1302_s28, %s952_s9  ;;  %s957_s7 = scalar_lea.hbm %s1417_s0, 256 }
  0x79   : > { %p958_p3 = scmp.lt.u32.totalorder %s1302_s28, %s1417_s0  ;;  %p959_p6 = scmp.lt.u32.totalorder %s957_s7, %s952_s9 }
  0x7a   : > { %p955_p1 = pnand %p954_p11, %p953_p8  ;;  %p961_p0 = scmp.lt.u32.totalorder %s952_s9, %s1302_s28 }
  0x7b   : > { %p960_p13 = por %p959_p6, %p958_p3 }
  0x7c   : > { %p956_p12 = pneg %p955_p1 }
  0x7d   : > { %p962_p7 = por %p961_p0, %p960_p13 }
  0x7f   : > { %p963_p5 = pnand %p962_p7, %p956_p12 }
  0x81   : > { %966 = shalt.err (!%p963_p5)
}
  0x82   : > { %s967_s15 = scalar_lea.vmem %s1310_s27, 128  ;;  %s1080_s6 = smov [#allocation3]  }
  0x83   : > { %p968_p8 = scmp.ne.s32.totalorder %s1310_s27, %s967_s15  ;;  %s972_s24 = sshll.u32 %s1080_s6, 4  ;;  %s973_s24 = int_to_ptr.vmem [resolvable:$false] %s972_s24 }
  0x84   : > { %s974_s16 = scalar_lea.vmem %s973_s24, 256  ;;  %p975_p4 = scmp.lt.s32.totalorder %s1310_s27, %s973_s24 }
  0x85   : > { %p970_p1 = pnand %p968_p8, %p954_p11  ;;  %p976_p3 = scmp.lt.s32.totalorder %s974_s16, %s967_s15 }
  0x87   : > { %p971_p9 = pneg %p970_p1  ;;  %p977_p6 = por %p976_p3, %p975_p4 }
  0x89   : > { %p978_p13 = pnand %p977_p6, %p971_p9 }
  0x8b   : > { %981 = shalt.err (!%p978_p13)
}
  0x8c   : > { %759 = dma.hbm_to_vmem [thread:$0]  (!%p1306_p10), %s1302_s28, 128, %s1310_s27, %s238_s29  }
  0x8d   : > { %p1437_p12 = scmp.ne.s32.totalorder %s1428_s26, 0 }
  0x8e   : > { %s1340_s9 = sand.u32 (!%p1437_p12), 1, %s1056_s19  }
  0x8f   : > { %257 = sbr.rel (%p1437_p12) target bundleno = 622 (0x26e), region = 40  ;;  %s660_s7 = sshll.u32 (!%p1437_p12), %s1340_s9, 3 }
  0x90   : > { %s260_s17 = scalar_lea.sflag (!%p1437_p12), [#allocation4], %s1340_s9  ;;  %s263_s8 = scalar_lea.vmem (!%p1437_p12), [#allocation3], %s660_s7 }
  0x96   : > { %1035 = dma.done.wait (%p1281_p2), %s260_s17, 128  }
  0x97   : > { %1037 = vsyncadd (%p1281_p2), %s260_s17, 4294967168  ;;  %p1438_p4 = scmp.ne.s32.totalorder %s1427_s25, 0 }
  0x99   : > { %1039 = dma.done.wait (%p1438_p4), [#allocation7], 272  }
  0x9a   : > { %1041 = vsyncadd (%p1438_p4), [#allocation7], 4294967024 }
  0x9b   : > { %1043 = dma.done.wait (%p1438_p4), [#allocation10], 1040  }
  0x9c   : > { %1045 = vsyncadd (%p1438_p4), [#allocation10], 4294966256  ;;  %vm311_vm0 = vcmask 261120   ;;  %v1081_v0 = vmov 0.0   ;;  %vm1082_vm1 = vmmov 0   ;;  %v830_v1 = vld [vmem:[#allocation6] sm:$0xff]  }
  0x9d   : > { %695 = vmatprep.subr.bf16.mxu0 %v1081_v0  ;;  %699 = vmatprep.mubr.msk.bf16.mxu0 %vm1082_vm1, %v1081_v0  ;;  %312 = vst.msk [vmem:[#allocation2] sm:$0xff] %vm311_vm0, %v1081_v0  ;;  %v831_v2 = vld [vmem:[#allocation6 + $0x8] sm:$0xff]   ;;  %v313_v3 = vld [vmem:[%s263_s8] sm:$0xff]  ;;  %s680_s25 = sshll.u32 %s1064_s21, 7  ;;  %s305_s26 = scalar_lea.vmem [#allocation12], %s660_s7 }
  0x9e   : > { %703 = vmatprep.subr.bf16.mxu1 %v1081_v0  ;;  %719 = vmatprep.mubr.msk.bf16.mxu1 %vm1082_vm1, %v1081_v0  ;;  %v832_v4 = vld [vmem:[#allocation9] sm:$0xff]   ;;  %v314_v5 = vpack.c.bf16 %v313_v3, %v313_v3  ;;  %v833_v6 = vld [vmem:[#allocation9 + $0x8] sm:$0xff]   ;;  %v834_v7 = vld [vmem:[#allocation9 + $0x10] sm:$0xff]   ;;  %s528_s10 = sshll.u32 %s305_s26, 4  ;;  %s1367_s14 = scalar_lea.hbm %s1422_s5, %s680_s25  ;;  %s1369_s10 = int_to_ptr.vmem [resolvable:$true] %s528_s10 }
  0x9f   : > { %696 = vmatpush3.bf16.msra.mxu0 %v830_v1  ;;  %704 = vmatpush3.bf16.msra.mxu1 %v832_v4  ;;  %v835_v8 = vld [vmem:[#allocation9 + $0x18] sm:$0xff]   ;;  %v836_v9 = vld [vmem:[#allocation9 + $0x20] sm:$0xff]   ;;  %v837_v10 = vld [vmem:[#allocation9 + $0x28] sm:$0xff]   ;;  %s515_s29 = scalar_lea.sflag [#allocation5], %s1340_s9  ;;  %s982_s15 = scalar_lea.vmem %s1369_s10, 128 }
  0xa0   : > { %697 = vmatprep.subr.bf16.mxu0 %v1081_v0  ;;  %705 = vmatprep.subr.bf16.mxu1 %v1081_v0  ;;  %v838_v11 = vld [vmem:[#allocation9 + $0x30] sm:$0xff]   ;;  %v839_v12 = vld [vmem:[#allocation9 + $0x38] sm:$0xff]   ;;  %v678_v27 = vld [vmem:[#allocation11] ss:$0 sm:$0xff]  ;;  %p983_p2 = scmp.ne.s32.totalorder %s1369_s10, %s982_s15  ;;  %p1439_p9 = scmp.ne.s32.totalorder %s1434_s11, 0 }
  0xa1   : > { %v666_v13 = vld [vmem:[#allocation8] ss:$0 sm:$0xff]  ;;  %s1083_s21 = smov [#allocation12]  }
  0xa2   : > { %p984_p10 = pnand %p983_p2, %p1439_p9  ;;  %s986_s6 = sshll.u32 %s1083_s21, 4  ;;  %s987_s6 = int_to_ptr.vmem [resolvable:$false] %s986_s6 }
  0xa3   : > { %698 = vmatpush3.bf16.msra.mxu0 %v831_v2  ;;  %706 = vmatpush3.bf16.msra.mxu1 %v833_v6  ;;  %s988_s24 = scalar_lea.vmem %s987_s6, 256  ;;  %p989_p0 = scmp.lt.s32.totalorder %s1369_s10, %s987_s6 }
  0xa4   : > { %707 = vmatprep.subr.bf16.mxu1 %v1081_v0  ;;  %v409_v21 = vld [vmem:[#allocation2] sm:$0xff]  ;;  %p985_p11 = pneg %p984_p10  ;;  %p990_p7 = scmp.lt.s32.totalorder %s988_s24, %s982_s15 }
  0xa6   : > { %700 = vmatmul.mubr.msk.bf16.vlgmr.msra.gmra.mrb[0].mxu0 %vm311_vm0, %v314_v5  ;;  %p991_p5 = por %p990_p7, %p989_p0 }
  0xa7   : > { %708 = vmatpush3.bf16.msra.mxu1 %v834_v7 }
  0xa8   : > { %709 = vmatprep.subr.bf16.mxu1 %v1081_v0  ;;  %p992_p8 = pnand %p991_p5, %p985_p11 }
  0xab   : > { %710 = vmatpush3.bf16.msra.mxu1 %v835_v8 }
  0xac   : > { %711 = vmatprep.subr.bf16.mxu1 %v1081_v0 }
  0xaf   : > { %712 = vmatpush3.bf16.msra.mxu1 %v836_v9 }
  0xb0   : > { %713 = vmatprep.subr.bf16.mxu1 %v1081_v0 }
  0xb3   : > { %714 = vmatpush3.bf16.msra.mxu1 %v837_v10 }
  0xb4   : > { %715 = vmatprep.subr.bf16.mxu1 %v1081_v0 }
  0xb7   : > { %716 = vmatpush3.bf16.msra.mxu1 %v838_v11 }
  0xb8   : > { %717 = vmatprep.subr.bf16.mxu1 %v1081_v0 }
  0xbb   : > { %718 = vmatpush3.bf16.msra.mxu1 %v839_v12 }
 0x179   : > { %v402_v14 = vpop.f32.mrb[0].mxu0 }
 0x17a   : > { %v403_v15 = vadd.f32 %v666_v13, %v402_v14  ;;  %v701_v16 = vpop.f32.mrb[1].mxu0 }
 0x17b   : > { %v405_v17 = vpop.f32.mrb[2].mxu0 }
 0x17c   : > { %v408_v18 = vmax.f32 %v403_v15, 0.0  ;;  %v702_v19 = vpop.f32.mrb[3].mxu0 }
 0x17e   : > { %v410_v20 = vpack.c.bf16 %v408_v18, %v408_v18 }
 0x180   : > { %720 = vmatmul.mubr.bf16.vlgmr.msra.gmra.mrb[0].mxu1 %v410_v20 }
 0x253   : > { %v493_v22 = vpop.f32.mrb[0].mxu1 }
 0x254   : > { %v499_v23 = vadd.f32 %v493_v22, %v409_v21  ;;  %v721_v24 = vpop.f32.mrb[1].mxu1 }
 0x255   : > { %v496_v25 = vpop.f32.mrb[2].mxu1 }
 0x256   : > { %500 = vst.msk [vmem:[#allocation2] sm:$0xff] %vm311_vm0, %v499_v23  ;;  %v722_v26 = vpop.f32.mrb[3].mxu1 }
 0x25d   : > { %v504_v28 = vld [vmem:[#allocation2] sm:$0xff] }
 0x25e   : > { %v512_v29 = vadd.f32 %v678_v27, %v504_v28 }
 0x260   : > { %513 = vst.msk [vmem:[%s305_s26] sm:$0xff] %vm311_vm0, %v512_v29 }
 0x261   : > { %995 = shalt.err (!%p992_p8)
}
 0x262   : > { %s996_s16 = scalar_lea.hbm %s1367_s14, 128  ;;  %s1000_s17 = scalar_lea.hbm %s1422_s5, 256 }
 0x263   : > { %p997_p1 = scmp.ne.s32.totalorder %s1367_s14, %s996_s16  ;;  %p1001_p13 = scmp.lt.u32.totalorder %s1367_s14, %s1422_s5 }
 0x264   : > { %p1002_p12 = scmp.lt.u32.totalorder %s1000_s17, %s996_s16  ;;  %p1004_p2 = scmp.lt.u32.totalorder %s996_s16, %s1367_s14 }
 0x265   : > { %p998_p3 = pnand %p997_p1, %p1439_p9 }
 0x266   : > { %p1003_p4 = por %p1002_p12, %p1001_p13 }
 0x267   : > { %p999_p6 = pneg %p998_p3 }
 0x268   : > { %p1005_p10 = por %p1004_p2, %p1003_p4 }
 0x26a   : > { %p1006_p11 = pnand %p1005_p10, %p999_p6 }
 0x26c   : > { %1009 = shalt.err (!%p1006_p11)
}
 0x26d   : > { %741 = dma.vmem_to_hbm [thread:$0]  (%p1439_p9), %s1369_s10, 128, %s1367_s14, %s515_s29  }
 0x26e PF: > { %s540_s26 = sand.u32 1, %s1052_s18   ;;  %p1440_p0 = scmp.ne.s32.totalorder %s1435_s13, 0 }
 0x26f   : > { %p1441_p7 = scmp.ge.s32.totalorder %s1072_s23, 2  ;;  %s541_s28 = scalar_lea.sflag [#allocation5], %s540_s26 }
 0x271   : > { %p761_p5 = pnand %p1441_p7, %p1440_p0 }
 0x273   : > { %1047 = dma.done.wait (!%p761_p5), %s541_s28, 128  }
 0x274   : > { %1049 = vsyncadd (!%p761_p5), %s541_s28, 4294967168  ;;  %s23_s23 = sadd.s32 1, %s1072_s23   ;;  %s1442_s18 = smov %s1056_s19 }
 0x275   : > { %p20_p8 = scmp.ge.s32.totalorder %s23_s23, 4   ;;  %s1443_s19 = smov %s1060_s20 }
 0x276   : > { %s1444_s20 = smov %s1290_s12  ;;  %s1445_s21 = smov %s1068_s22 }
 0x277   : > { %s1446_s22 = smov %s1448_s30  ;;  %22 = sbr.rel (!%p20_p8) target bundleno = 8 (0x8), region = 112 }
 0x27e   :  { %546 = vsyncpa [#allocation4], 1 }
 0x27f   :  { %548 = vsyncpa [#allocation4 + $0x1], 1 }
 0x280   :  { %549 = vsyncpa [#allocation7], 1 }
 0x281   :  { %550 = vsyncpa [#allocation10], 1 }
 0x282   :  { %551 = vsyncpa [#allocation5], 1 }
 0x283   :  { %553 = vsyncpa [#allocation5 + $0x1], 1 }

</bundles_post_ra>
